<compile_context>
chip_gen: v7x
topology: tpu7x:2x2x1
jax: 0.10.0
libtpu: 0.0.40
codegen_flags: <defaults>
</compile_context>

<pallas_src>
import functools

import numpy as np
import jax
import jax.numpy as jnp
from jax.experimental import pallas as pl
from jax.experimental.pallas import tpu as pltpu

# ---- module "parameters" (pure scalars, replicating __init__ arithmetic) ----
_LAMBDA = 2
_MAX_UPDATE_ARG = 10
_mu = 1.0 / np.power(1.0 / _MAX_UPDATE_ARG, 1.0 / _LAMBDA)   # 1 / (1/10)^(1/2)
MAX_UPDATE = float(1.0 / (_mu - 1.0))                        # ~0.46248

_LANES = 128
_TILE_ROWS = 2048                  # (2048, 128) f32 block = 1 MiB per buffer
_FUSED_MAX_ROWS = 2048             # <= 1 MiB per input -> single fused block
_VMEM_LIMIT = 32 * 1024 * 1024     # safe on v5e/v6e (128 MiB) and v7x (64 MiB)
_NCORES = 2                        # leading "parallel" axis (v7x megacore)


# ----------------------------- fused small path ------------------------------
def _fused_kernel(p_ref, t_ref, o_ref):
    """Whole problem resident in VMEM: max + rate-weighted sum in one shot."""
    d = jnp.abs(p_ref[...].astype(jnp.float32) - t_ref[...].astype(jnp.float32))
    # lane-pad zeros give d == 0 -> rate == 1 -> contribute 0 to the sum,
    # and d >= 0 everywhere so they never affect the max.
    inv_max = 1.0 / ((1.0 + MAX_UPDATE) * jnp.max(d))
    base = 1.0 - d * inv_max
    rate = 1.0 / (base ** _LAMBDA)
    o_ref[...] = jnp.sum(rate * d).reshape(1, 1)


# ---------------------------- tiled two-pass path -----------------------------
def _max_kernel(p_ref, t_ref, o_ref, acc_ref, *, blocks_per_core, tile_rows,
                total_rows):
    """Per-core lane-dense partial max of |pred - target|."""
    c = pl.program_id(0)
    i = pl.program_id(1)

    @pl.when(i == 0)
    def _():
        acc_ref[...] = jnp.zeros_like(acc_ref)   # diffs >= 0, so 0 is a safe identity

    d = jnp.abs(p_ref[...].astype(jnp.float32) - t_ref[...].astype(jnp.float32))
    # mask rows beyond the true row count (covers the partial edge block and
    # the clamped duplicate block of the last core).
    row0 = (c * blocks_per_core + i) * tile_rows
    rid = row0 + jax.lax.broadcasted_iota(jnp.int32, d.shape, 0)
    d = jnp.where(rid < total_rows, d, 0.0)

    # (tile_rows, 128) -> (8, 128): pure elementwise vreg maxes (VPU only).
    acc_ref[...] = jnp.maximum(acc_ref[...],
                               jnp.max(d.reshape(-1, 8, _LANES), axis=0))

    @pl.when(i == pl.num_programs(1) - 1)
    def _():
        o_ref[0] = acc_ref[...]


def _sum_kernel(pm_ref, p_ref, t_ref, o_ref, acc_ref, *, blocks_per_core,
                tile_rows, total_rows):
    """Per-core lane-dense partial sum of rate * |pred - target|."""
    c = pl.program_id(0)
    i = pl.program_id(1)

    @pl.when(i == 0)
    def _():
        acc_ref[...] = jnp.zeros_like(acc_ref)

    d = jnp.abs(p_ref[...].astype(jnp.float32) - t_ref[...].astype(jnp.float32))
    row0 = (c * blocks_per_core + i) * tile_rows
    rid = row0 + jax.lax.broadcasted_iota(jnp.int32, d.shape, 0)
    d = jnp.where(rid < total_rows, d, 0.0)     # masked rows: d=0 -> rate=1 -> 0

    # global max from the (tiny, VMEM-resident) per-core partial-max array.
    inv_max = 1.0 / ((1.0 + MAX_UPDATE) * jnp.max(pm_ref[...]))
    base = 1.0 - d * inv_max
    rate = 1.0 / (base ** _LAMBDA)

    acc_ref[...] += jnp.sum((rate * d).reshape(-1, 8, _LANES), axis=0)

    @pl.when(i == pl.num_programs(1) - 1)
    def _():
        o_ref[0] = acc_ref[...]


# --------------------------------- wrapper ------------------------------------
def focal_loss_regression(pred, target):
    """Pallas implementation of Focal_loss_regression.forward."""
    assert pred.shape == target.shape
    n = int(np.prod(pred.shape))

    pf = pred.reshape(-1)          # native dtype; cast happens inside kernels
    tf = target.reshape(-1)

    # Only the ragged tail (< 128 elements) ever needs zero padding; for
    # lane-aligned sizes (the common case) the reshape below is a free bitcast.
    pad = (-n) % _LANES
    if pad:
        pf = jnp.concatenate([pf, jnp.zeros((pad,), pf.dtype)])
        tf = jnp.concatenate([tf, jnp.zeros((pad,), tf.dtype)])
    rows = (n + pad) // _LANES
    p2 = pf.reshape(rows, _LANES)
    t2 = tf.reshape(rows, _LANES)

    # ---- small path: everything fits in VMEM -> one fused kernel ----
    if rows <= _FUSED_MAX_ROWS:
        total = pl.pallas_call(
            _fused_kernel,
            out_shape=jax.ShapeDtypeStruct((1, 1), jnp.float32),
            grid=(1,),
            in_specs=[pl.BlockSpec((rows, _LANES), lambda i: (0, 0)),
                      pl.BlockSpec((rows, _LANES), lambda i: (0, 0))],
            out_specs=pl.BlockSpec((1, 1), lambda i: (0, 0)),
            compiler_params=pltpu.CompilerParams(
                dimension_semantics=("arbitrary",),
                vmem_limit_bytes=_VMEM_LIMIT),
        )(p2, t2)
        return total[0, 0] / n

    # ---- large path: two streaming passes with big tiles ----
    nb = -(-rows // _TILE_ROWS)                 # number of row blocks
    ncores = _NCORES if nb >= 2 else 1
    bpc = -(-nb // ncores)                      # blocks per core
    grid = (ncores, bpc)

    def data_map(c, i):
        # clamp so the (possibly) over-hanging blocks of the last core re-read
        # the final valid block; their contribution is masked out in-kernel.
        return (jnp.minimum(c * bpc + i, nb - 1), 0)

    data_spec = pl.BlockSpec((_TILE_ROWS, _LANES), data_map)
    part_spec = pl.BlockSpec((1, 8, _LANES), lambda c, i: (c, 0, 0))
    params = pltpu.CompilerParams(
        dimension_semantics=("parallel", "arbitrary"),
        vmem_limit_bytes=_VMEM_LIMIT)

    # pass 1: per-core lane-dense partial maxes of |pred - target|
    pmax = pl.pallas_call(
        functools.partial(_max_kernel, blocks_per_core=bpc,
                          tile_rows=_TILE_ROWS, total_rows=rows),
        out_shape=jax.ShapeDtypeStruct((ncores, 8, _LANES), jnp.float32),
        grid=grid,
        in_specs=[data_spec, data_spec],
        out_specs=part_spec,
        scratch_shapes=[pltpu.VMEM((8, _LANES), jnp.float32)],
        compiler_params=params,
    )(p2, t2)

    # pass 2: per-core lane-dense partial sums of rate * |pred - target|
    psum = pl.pallas_call(
        functools.partial(_sum_kernel, blocks_per_core=bpc,
                          tile_rows=_TILE_ROWS, total_rows=rows),
        out_shape=jax.ShapeDtypeStruct((ncores, 8, _LANES), jnp.float32),
        grid=grid,
        in_specs=[pl.BlockSpec((ncores, 8, _LANES), lambda c, i: (0, 0, 0)),
                  data_spec, data_spec],
        out_specs=part_spec,
        scratch_shapes=[pltpu.VMEM((8, _LANES), jnp.float32)],
        compiler_params=params,
    )(pmax, p2, t2)

    return jnp.sum(psum) / n   # mean over the ORIGINAL element count


# ------------------------------- reference ------------------------------------
def _reference(pred, target):
    """Pure-JAX reference for correctness checking."""
    d = jnp.abs(pred.astype(jnp.float32) - target.astype(jnp.float32))
    diff_max = (1.0 + MAX_UPDATE) * jnp.max(d)
    rate = 1.0 / ((1.0 - d / diff_max) ** _LAMBDA)
    return jnp.mean(rate * d)


if __name__ == "__main__":
    key = jax.random.PRNGKey(0)
    shapes = [
        (2, 4, 16, 16),     # small -> fused single-block path (primary test)
        (8, 8, 80, 80),     # larger -> tiled two-pass path (partial edge block)
        (7, 13, 61, 67),    # tiled path with a ragged (non-128-aligned) tail
    ]
    for shape in shapes:
        key, k1, k2 = jax.random.split(key, 3)
        pred = jax.random.normal(k1, shape, dtype=jnp.float32)
        target = jax.random.normal(k2, shape, dtype=jnp.float32)

        loss = jax.block_until_ready(focal_loss_regression(pred, target))
        ref = jax.block_until_ready(_reference(pred, target))
        np.testing.assert_allclose(np.asarray(loss), np.asarray(ref),
                                   rtol=5e-5, atol=1e-6)

    print("KERNEL_OK")
</pallas_src>

<mosaic_0001>
module attributes {stable_mosaic.version = 11 : i64} {
  func.func @_fused_kernel(%arg0: i32, %arg1: memref<16x128xf32, #tpu.memory_space<vmem>>, %arg2: memref<16x128xf32, #tpu.memory_space<vmem>>, %arg3: memref<1x1xf32, #tpu.memory_space<vmem>>) attributes {dimension_semantics = [#tpu.dimension_semantics<arbitrary>], iteration_bounds = array<i64: 1>, scalar_prefetch = 0 : i64, scratch_operands = 0 : i64, tpu.core_type = #tpu.core_type<tc>, window_params = [{pipeline_mode = #tpu.pipeline_mode<synchronous>, transform_indices = @transform_0, window_bounds = array<i64: 16, 128>}, {pipeline_mode = #tpu.pipeline_mode<synchronous>, transform_indices = @transform_1, window_bounds = array<i64: 16, 128>}, {pipeline_mode = #tpu.pipeline_mode<synchronous>, transform_indices = @transform_2, window_bounds = array<i64: 1, 1>}]} {
    %c0 = arith.constant 0 : index
    %c0_0 = arith.constant 0 : index
    %0 = vector.load %arg1[%c0, %c0_0] : memref<16x128xf32, #tpu.memory_space<vmem>>, vector<16x128xf32>
    %c0_1 = arith.constant 0 : index
    %c0_2 = arith.constant 0 : index
    %1 = vector.load %arg2[%c0_1, %c0_2] : memref<16x128xf32, #tpu.memory_space<vmem>>, vector<16x128xf32>
    %2 = arith.subf %0, %1 : vector<16x128xf32>
    %3 = math.absf %2 : vector<16x128xf32>
    %4 = vector.shape_cast %3 : vector<16x128xf32> to vector<1x16x128xf32>
    %cst = arith.constant dense<0xFF800000> : vector<1xf32>
    %5 = vector.multi_reduction <maximumf>, %4, %cst [1, 2] : vector<1x16x128xf32> to vector<1xf32>
    %6 = vector.shape_cast %5 : vector<1xf32> to vector<1x1x1xf32>
    %7 = vector.extract %6[0, 0, 0] : f32 from vector<1x1x1xf32>
    %cst_3 = arith.constant 1.4624753 : f32
    %8 = arith.mulf %cst_3, %7 : f32
    %cst_4 = arith.constant 1.000000e+00 : f32
    %9 = arith.divf %cst_4, %8 : f32
    %10 = vector.broadcast %9 : f32 to vector<16x128xf32>
    %11 = arith.mulf %3, %10 : vector<16x128xf32>
    %cst_5 = arith.constant 1.000000e+00 : f32
    %12 = vector.broadcast %cst_5 : f32 to vector<16x128xf32>
    %13 = arith.subf %12, %11 : vector<16x128xf32>
    %14 = arith.mulf %13, %13 : vector<16x128xf32>
    %cst_6 = arith.constant 1.000000e+00 : f32
    %15 = vector.broadcast %cst_6 : f32 to vector<16x128xf32>
    %16 = arith.divf %15, %14 : vector<16x128xf32>
    %17 = arith.mulf %16, %3 : vector<16x128xf32>
    %18 = vector.shape_cast %17 : vector<16x128xf32> to vector<1x16x128xf32>
    %cst_7 = arith.constant dense<0.000000e+00> : vector<1xf32>
    %19 = vector.multi_reduction <add>, %18, %cst_7 [1, 2] : vector<1x16x128xf32> to vector<1xf32>
    %20 = vector.shape_cast %19 : vector<1xf32> to vector<1x1x1xf32>
    %21 = vector.extract %20[0, 0, 0] : f32 from vector<1x1x1xf32>
    %22 = vector.broadcast %21 : f32 to vector<1x1xf32>
    %c0_8 = arith.constant 0 : index
    %c0_9 = arith.constant 0 : index
    %23 = vector.load %arg3[%c0_8, %c0_9] : memref<1x1xf32, #tpu.memory_space<vmem>>, vector<1x1xf32>
    tpu.vector_store %arg3[%c0_8, %c0_9], %22 {strides = array<i32>} : memref<1x1xf32, #tpu.memory_space<vmem>>, vector<1x1xf32>,
    return
  }
  func.func @transform_0(%arg0: i32) -> (i32, i32) {
    %c0_i32 = arith.constant 0 : i32
    %c0_i32_0 = arith.constant 0 : i32
    %c0_i32_1 = arith.constant 0 : i32
    return %c0_i32, %c0_i32_0 : i32, i32
  }
  func.func @transform_1(%arg0: i32) -> (i32, i32) {
    %c0_i32 = arith.constant 0 : i32
    %c0_i32_0 = arith.constant 0 : i32
    %c0_i32_1 = arith.constant 0 : i32
    return %c0_i32, %c0_i32_0 : i32, i32
  }
  func.func @transform_2(%arg0: i32) -> (i32, i32) {
    %c0_i32 = arith.constant 0 : i32
    %c0_i32_0 = arith.constant 0 : i32
    %c0_i32_1 = arith.constant 0 : i32
    return %c0_i32, %c0_i32_0 : i32, i32
  }
}

</mosaic_0001>

<bundles_post_ra>
// kernel: tpu_custom_call.1
= control target key start
LH: loop header
LB: loop body
LE: loop exit
PB: predicated region body
PF: predicated region fallthrough
CT: control target
= control target key end

     0   :  { %7 = vsyncpa [#allocation3], 0  ;;  %s249_s0 = inlined_call_operand.hbm [shape: f32[16,128], index: 0, kind: input, shape index: {}]   ;;  %s250_s1 = inlined_call_operand.hbm [shape: f32[16,128], index: 1, kind: input, shape index: {}]   ;;  %s251_s2 = inlined_call_operand.hbm [shape: f32[1,1], index: 2, kind: output, shape index: {}]  }
   0x1   :  { %8 = vsyncpa [#allocation6], 0 }
   0x2   :  { %9 = vsyncpa [#allocation4], 0  ;;  %s193_s9 = smov [#allocation2]   ;;  %s121_s13 = scalar_lea.hbm %s249_s0, 256 }
   0x3   :  { %s15_s10 = sshll.u32 %s193_s9, 4  ;;  %p122_p0 = scmp.ne.s32.totalorder %s249_s0, %s121_s13  ;;  %s16_s10 = int_to_ptr.vmem [resolvable:$true] %s15_s10 }
   0x4   :  { %p125_p1 = scmp.lt.u32.totalorder %s121_s13, %s249_s0 }
   0x6   :  { %p127_p2 = pnand %p125_p1, %p122_p0 }
   0x8   :  { %130 = shalt.err (!%p127_p2)
}
   0x9   :  { %s131_s18 = scalar_lea.vmem %s16_s10, 256  ;;  %p136_p4 = scmp.lt.s32.totalorder %s16_s10, %s16_s10 }
   0xa   :  { %p132_p3 = scmp.ne.s32.totalorder %s16_s10, %s131_s18  ;;  %p137_p5 = scmp.lt.s32.totalorder %s131_s18, %s131_s18 }
   0xc   :  { %p138_p6 = por %p137_p5, %p136_p4 }
   0xe   :  { %p139_p7 = pnand %p138_p6, %p132_p3 }
  0x10   :  { %142 = shalt.err (!%p139_p7)
}
  0x11   :  { %s194_s19 = smov 128   ;;  %s195_s20 = smov 8  }
  0x12   :  { %21 = dma.hbm_to_vmem [thread:$0]  %s249_s0, 256, %s16_s10, [#allocation3], %s194_s19, %s194_s19, %s195_s20  }
  0x13   :  { %s196_s23 = smov [#allocation5]   ;;  %s143_s27 = scalar_lea.hbm %s250_s1, 256 }
  0x14   :  { %s27_s24 = sshll.u32 %s196_s23, 4  ;;  %p144_p8 = scmp.ne.s32.totalorder %s250_s1, %s143_s27  ;;  %s28_s24 = int_to_ptr.vmem [resolvable:$true] %s27_s24 }
  0x15   :  { %p147_p9 = scmp.lt.u32.totalorder %s143_s27, %s250_s1 }
  0x17   :  { %p149_p10 = pnand %p147_p9, %p144_p8 }
  0x19   :  { %152 = shalt.err (!%p149_p10)
}
  0x1a   :  { %s153_s4 = scalar_lea.vmem %s28_s24, 256  ;;  %p158_p12 = scmp.lt.s32.totalorder %s28_s24, %s28_s24 }
  0x1b   :  { %p154_p11 = scmp.ne.s32.totalorder %s28_s24, %s153_s4  ;;  %p159_p13 = scmp.lt.s32.totalorder %s153_s4, %s153_s4 }
  0x1d   :  { %p160_p0 = por %p159_p13, %p158_p12 }
  0x1f   :  { %p161_p1 = pnand %p160_p0, %p154_p11 }
  0x21   :  { %164 = shalt.err (!%p161_p1)
}
  0x22   :  { %33 = dma.hbm_to_vmem [thread:$0]  %s250_s1, 256, %s28_s24, [#allocation6], %s194_s19, %s194_s19, %s195_s20  }
  0x23   :  { %187 = dma.done.wait [#allocation3], 256  }
  0x24   :  { %188 = vsyncadd [#allocation3], 4294967040 }
  0x25   :  { %189 = dma.done.wait [#allocation6], 256  }
  0x26   :  { %190 = vsyncadd [#allocation6], 4294967040  ;;  %v40_v0 = vld [vmem:[#allocation2] sm:$0xff]  ;;  %v41_v1 = vld [vmem:[#allocation2 + $0x8] sm:$0xff]  ;;  %s197_s8 = smov [#allocation7]   ;;  %vm86_vm0 = vcmask 0  }
  0x27   :  { %v42_v2 = vld [vmem:[#allocation5] sm:$0xff]  ;;  %v43_v3 = vld [vmem:[#allocation5 + $0x8] sm:$0xff]  ;;  %s94_s9 = sshll.u32 %s197_s8, 4  ;;  %s95_s9 = int_to_ptr.vmem [resolvable:$true] %s94_s9 }
  0x28   :  { %v44_v4 = vsub.f32 %v40_v0, %v42_v2  ;;  %v45_v5 = vsub.f32 %v41_v1, %v43_v3  ;;  %s165_s11 = scalar_lea.vmem %s95_s9, 16  ;;  %s169_s12 = scalar_lea.vmem %s95_s9, 32 }
  0x29   :  { %p166_p2 = scmp.ne.s32.totalorder %s95_s9, %s165_s11  ;;  %p170_p3 = scmp.lt.s32.totalorder %s95_s9, %s95_s9 }
  0x2a   :  { %v46_v6 = vand.u32 2147483647, %v44_v4  ;;  %v47_v7 = vand.u32 2147483647, %v45_v5  ;;  %p171_p4 = scmp.lt.s32.totalorder %s169_s12, %s165_s11 }
  0x2c   :  { %v48_v8 = vmax.f32 %v46_v6, %v47_v7  ;;  %p172_p5 = por %p171_p4, %p170_p3 }
  0x2e   :  { %49 = vmax.xlane.f32.xlu0 %v48_v8  ;;  %p173_p6 = pnand %p172_p5, %p166_p2 }
  0xbb   :  { %v50_v9 = vpop.xlane.xlu0 %49 }
  0xbc   :  { %v51_v10 = vrot.slane %v50_v9, 4 }
  0xbe   :  { %v52_v11 = vmax.f32 %v50_v9, %v51_v10 }
  0xc0   :  { %v53_v12 = vrot.slane %v52_v11, 2 }
  0xc2   :  { %v54_v13 = vmax.f32 %v52_v11, %v53_v12 }
  0xc4   :  { %v55_v14 = vrot.slane %v54_v13, 1 }
  0xc6   :  { %v56_v15 = vmax.f32 %v54_v13, %v55_v14 }
  0xc8   :  { %104 = vpush %v56_v15 }
  0xf9   :  { %s105_s1 = spop %104 }
  0xfa   :  { %s58_s6 = smul.f32 1.4624753, %s105_s1 }
  0xfc   :  { %v59_v16 = vstv %s58_s6 }
  0xfd   :  { %115 = vrcp.f32 %v59_v16 }
 0x107   :  { %v116_v17 = vpop.eup %115 }
 0x108   :  { %106 = vpush %v116_v17 }
 0x139   :  { %s107_s7 = spop %106 }
 0x13a   :  { %v62_v18 = vstv %s107_s7 }
 0x13b   :  { %v63_v19 = vmul.f32 %v62_v18, %v46_v6  ;;  %v64_v20 = vmul.f32 %v62_v18, %v47_v7 }
 0x13d   :  { %v65_v21 = vsub.f32 1.0, %v63_v19  ;;  %v66_v22 = vsub.f32 1.0, %v64_v20 }
 0x13f   :  { %v67_v23 = vmul.f32 %v65_v21, %v65_v21  ;;  %v68_v24 = vmul.f32 %v66_v22, %v66_v22 }
 0x141   :  { %117 = vrcp.f32 %v67_v23 }
 0x142   :  { %119 = vrcp.f32 %v68_v24 }
 0x14b   :  { %v118_v25 = vpop.eup %117 }
 0x14c   :  { %v120_v26 = vpop.eup %119  ;;  %v73_v27 = vmul.f32 %v118_v25, %v46_v6 }
 0x14d   :  { %v74_v28 = vmul.f32 %v120_v26, %v47_v7 }
 0x14f   :  { %v75_v29 = vadd.f32 %v74_v28, %v73_v27 }
 0x151   :  { %76 = vadd.xlane.f32.xlu0 %v75_v29 }
 0x1de   :  { %v77_v30 = vpop.xlane.xlu0 %76 }
 0x1df   :  { %v78_v31 = vrot.slane %v77_v30, 4 }
 0x1e1   :  { %v79_v32 = vadd.f32 %v78_v31, %v77_v30 }
 0x1e3   :  { %v80_v33 = vrot.slane %v79_v32, 2 }
 0x1e5   :  { %v81_v34 = vadd.f32 %v80_v33, %v79_v32 }
 0x1e7   :  { %v82_v35 = vrot.slane %v81_v34, 1 }
 0x1e9   :  { %v83_v36 = vadd.f32 %v82_v35, %v81_v34 }
 0x1eb   :  { %108 = vpush %v83_v36 }
 0x21c   :  { %s109_s10 = spop %108 }
 0x21d   :  { %v85_v37 = vstv %s109_s10 }
 0x21e   :  { %87 = vst.msk [vmem:[#allocation7] sm:$0x1] %vm86_vm0, %v85_v37 }
 0x21f   :  { %176 = shalt.err (!%p173_p6)
}
 0x220   :  { %s177_s15 = scalar_lea.hbm %s251_s2, 16 }
 0x221   :  { %p178_p7 = scmp.ne.s32.totalorder %s251_s2, %s177_s15  ;;  %p181_p8 = scmp.lt.u32.totalorder %s177_s15, %s251_s2 }
 0x223   :  { %p183_p9 = pnand %p181_p8, %p178_p7 }
 0x225   :  { %186 = shalt.err (!%p183_p9)
}
 0x226   :  { %97 = dma.vmem_to_hbm [thread:$0]  %s95_s9, 16, %s251_s2, [#allocation4]  }
 0x227   :  { %191 = dma.done.wait [#allocation4], 16  }
 0x228   :  { %192 = vsyncadd [#allocation4], 4294967280 }
 0x229   :  { %101 = vsyncpa [#allocation3], 1 }
 0x22a   :  { %102 = vsyncpa [#allocation6], 1 }
 0x22b   :  { %103 = vsyncpa [#allocation4], 1 }

</bundles_post_ra>
